<compile_context>
chip_gen: v5e
topology: v5e:2x2
jax: 0.10.0
libtpu: 0.0.40
codegen_flags: <defaults>
</compile_context>

<pallas_src>
import functools

import jax
import jax.numpy as jnp
from jax.experimental import pallas as pl
from jax.experimental.pallas import tpu as pltpu


# --------------------------------------------------------------------------
# Kernels
# --------------------------------------------------------------------------
def _ca_fused_kernel(x_ref, w1t_ref, w2t_ref, o_ref, *, inv_hw):
    """Single-pass: x_ref (Bt, C, HW), w1t (C, Cr), w2t (Cr, C), o_ref (Bt, C, HW)."""
    x = x_ref[...]                                              # native dtype

    # Per-image channel pooling over the flattened spatial (lane) axis.
    # f32 accumulation without materializing a full f32 copy of the block.
    avg = jnp.sum(x, axis=-1, dtype=jnp.float32) * inv_hw       # (Bt, C) f32
    mx = jnp.max(x, axis=-1).astype(jnp.float32)                # (Bt, C) f32

    w1t = w1t_ref[...]                                          # f32 (pre-cast in wrapper)
    w2t = w2t_ref[...]

    def mlp(p):                                                 # (Bt, C) -> (Bt, C)
        h = jnp.maximum(jnp.dot(p, w1t, preferred_element_type=jnp.float32), 0.0)
        return jnp.dot(h, w2t, preferred_element_type=jnp.float32)

    gate = jax.nn.sigmoid(mlp(avg) + mlp(mx))                   # (Bt, C) f32

    # Apply the gate in the input's native dtype (keeps VMEM at ~one block).
    o_ref[...] = (gate.astype(x.dtype)[:, :, None] * x).astype(o_ref.dtype)


def _ca_gate_kernel(x_ref, w1t_ref, w2t_ref, gate_ref, sum_acc, max_acc, *, hw, tile):
    """Two-pass, pass 1: accumulate per-image sum/max over HW tiles, then run the gate MLP."""
    h = pl.program_id(1)

    @pl.when(h == 0)
    def _():
        sum_acc[...] = jnp.zeros_like(sum_acc)
        max_acc[...] = jnp.full_like(max_acc, -jnp.inf)

    x = x_ref[...].astype(jnp.float32)                          # (Bt, C, tile)
    if hw % tile != 0:
        # Only the ragged last tile has out-of-bounds lanes; mask them.
        lane = jax.lax.broadcasted_iota(jnp.int32, x.shape, 2) + h * tile
        valid = lane < hw
        xs = jnp.where(valid, x, 0.0)
        xm = jnp.where(valid, x, -jnp.inf)
    else:
        xs = xm = x
    sum_acc[...] += jnp.sum(xs, axis=-1)
    max_acc[...] = jnp.maximum(max_acc[...], jnp.max(xm, axis=-1))

    @pl.when(h == pl.num_programs(1) - 1)
    def _():
        w1t = w1t_ref[...]
        w2t = w2t_ref[...]

        def mlp(p):
            hid = jnp.maximum(jnp.dot(p, w1t, preferred_element_type=jnp.float32), 0.0)
            return jnp.dot(hid, w2t, preferred_element_type=jnp.float32)

        gate = jax.nn.sigmoid(mlp(sum_acc[...] * (1.0 / hw)) + mlp(max_acc[...]))
        gate_ref[...] = gate[:, :, None].astype(gate_ref.dtype)


def _ca_apply_kernel(gate_ref, x_ref, o_ref):
    """Two-pass, pass 2: out = gate * x, tiled over (batch, HW)."""
    x = x_ref[...]                                              # (Bt, C, T)
    o_ref[...] = (gate_ref[...].astype(x.dtype) * x).astype(o_ref.dtype)


# --------------------------------------------------------------------------
# Hardware-aware sizing helpers
# --------------------------------------------------------------------------
def _tpu_vmem_capacity_bytes():
    try:
        info = pltpu.get_tpu_info()
        cap = getattr(info, "vmem_capacity_bytes", None)
        if cap:
            return int(cap)
    except Exception:
        pass
    return 64 << 20  # conservative default (v7x per-core VMEM)


def _num_tensorcores():
    """Best-effort TensorCores-per-chip (used only to decide grid >= num_cores)."""
    try:
        info = pltpu.get_tpu_info()
        for attr in ("num_cores", "core_count", "num_tensorcores", "tensorcores_per_chip"):
            v = getattr(info, attr, None)
            if isinstance(v, int) and v > 0:
                return v
    except Exception:
        pass
    try:
        kind = jax.devices()[0].device_kind.lower()
    except Exception:
        return 1
    if "lite" in kind or "v5e" in kind or "v6e" in kind:
        return 1
    if any(t in kind for t in ("v7", "v5p", "v4", "v3")):
        return 2
    return 1


# --------------------------------------------------------------------------
# Paths
# --------------------------------------------------------------------------
def _single_pass(x_flat, w1t, w2t, *, target_block_bytes, vmem_budget, num_tc, weight_bytes):
    B, C, HW = x_flat.shape
    Cr = w1t.shape[1]
    dtype_bytes = jnp.dtype(x_flat.dtype).itemsize
    per_img_bytes = C * HW * dtype_bytes

    bt = max(1, min(B, target_block_bytes // max(per_img_bytes, 1)))
    if num_tc > 1:
        # Prefer >= num_tc grid steps so the parallel batch axis can shard across
        # TensorCores, but never shrink blocks below ~2 MiB for it.
        while bt > 1 and pl.cdiv(B, bt) < num_tc and (bt - 1) * per_img_bytes >= (2 << 20):
            bt -= 1
    grid = (pl.cdiv(B, bt),)   # ragged last block: OOB reads unused, OOB writes dropped

    block_bytes = bt * per_img_bytes
    # 2x double-buffered in + 2x out + in-kernel temps/weights + slack.
    vmem_limit = int(5 * block_bytes + 4 * weight_bytes + (4 << 20))
    vmem_limit = max(8 << 20, min(vmem_limit, vmem_budget))

    cost = pl.CostEstimate(
        flops=3 * B * C * HW + 8 * B * C * Cr,
        transcendentals=B * C,
        bytes_accessed=2 * B * C * HW * dtype_bytes + 2 * weight_bytes,
    )

    kernel = functools.partial(_ca_fused_kernel, inv_hw=1.0 / HW)
    return pl.pallas_call(
        kernel,
        out_shape=jax.ShapeDtypeStruct((B, C, HW), x_flat.dtype),
        grid_spec=pltpu.PrefetchScalarGridSpec(
            num_scalar_prefetch=0,
            grid=grid,
            in_specs=[
                pl.BlockSpec((bt, C, HW), lambda b: (b, 0, 0)),   # x (Bt images / step)
                pl.BlockSpec((C, Cr), lambda b: (0, 0)),          # W1^T (resident)
                pl.BlockSpec((Cr, C), lambda b: (0, 0)),          # W2^T (resident)
            ],
            out_specs=pl.BlockSpec((bt, C, HW), lambda b: (b, 0, 0)),
        ),
        compiler_params=pltpu.CompilerParams(
            dimension_semantics=("parallel",),
            vmem_limit_bytes=vmem_limit,
        ),
        cost_estimate=cost,
    )(x_flat, w1t, w2t)


def _two_pass(x_flat, w1t, w2t, *, target_block_bytes, vmem_budget, weight_bytes):
    B, C, HW = x_flat.shape
    Cr = w1t.shape[1]
    dtype = x_flat.dtype
    dtype_bytes = jnp.dtype(dtype).itemsize
    per_img_bytes = C * HW * dtype_bytes
    per_row_bytes = C * dtype_bytes

    # ---- pass 1: per-image sum/max over HW tiles -> gate (B, C, 1) f32 ----
    if per_img_bytes <= target_block_bytes:
        bt1 = max(1, min(B, target_block_bytes // max(per_img_bytes, 1)))
        t1 = HW
    else:
        bt1 = 1
        t1 = (target_block_bytes // max(per_row_bytes, 1)) // 128 * 128
        t1 = max(128, t1)
        if t1 >= HW:
            t1 = HW
    grid1 = (pl.cdiv(B, bt1), pl.cdiv(HW, t1))

    tile1_bytes = bt1 * C * t1 * dtype_bytes
    vmem1 = int(4 * tile1_bytes + 4 * weight_bytes + 16 * bt1 * C * 4 + (4 << 20))
    vmem1 = max(8 << 20, min(vmem1, vmem_budget))

    gate = pl.pallas_call(
        functools.partial(_ca_gate_kernel, hw=HW, tile=t1),
        out_shape=jax.ShapeDtypeStruct((B, C, 1), jnp.float32),
        grid_spec=pltpu.PrefetchScalarGridSpec(
            num_scalar_prefetch=0,
            grid=grid1,
            in_specs=[
                pl.BlockSpec((bt1, C, t1), lambda b, h: (b, 0, h)),
                pl.BlockSpec((C, Cr), lambda b, h: (0, 0)),
                pl.BlockSpec((Cr, C), lambda b, h: (0, 0)),
            ],
            out_specs=pl.BlockSpec((bt1, C, 1), lambda b, h: (b, 0, 0)),
            scratch_shapes=[
                pltpu.VMEM((bt1, C), jnp.float32),   # sum accumulator
                pltpu.VMEM((bt1, C), jnp.float32),   # max accumulator
            ],
        ),
        compiler_params=pltpu.CompilerParams(
            dimension_semantics=("parallel", "arbitrary"),
            vmem_limit_bytes=vmem1,
        ),
    )(x_flat, w1t, w2t)

    # ---- pass 2: out = gate * x, tiled over (batch, HW) ----
    if 2 * per_img_bytes <= target_block_bytes:
        bt2 = max(1, min(B, target_block_bytes // max(2 * per_img_bytes, 1)))
        t2 = HW
    else:
        bt2 = 1
        t2 = (target_block_bytes // max(2 * per_row_bytes, 1)) // 128 * 128
        t2 = max(128, t2)
        if t2 >= HW:
            t2 = HW
    grid2 = (pl.cdiv(B, bt2), pl.cdiv(HW, t2))

    tile2_bytes = bt2 * C * t2 * dtype_bytes
    vmem2 = int(5 * tile2_bytes + 8 * bt2 * C * 4 + (4 << 20))
    vmem2 = max(8 << 20, min(vmem2, vmem_budget))

    return pl.pallas_call(
        _ca_apply_kernel,
        out_shape=jax.ShapeDtypeStruct((B, C, HW), dtype),
        grid_spec=pltpu.PrefetchScalarGridSpec(
            num_scalar_prefetch=0,
            grid=grid2,
            in_specs=[
                pl.BlockSpec((bt2, C, 1), lambda b, h: (b, 0, 0)),   # gate
                pl.BlockSpec((bt2, C, t2), lambda b, h: (b, 0, h)),  # x
            ],
            out_specs=pl.BlockSpec((bt2, C, t2), lambda b, h: (b, 0, h)),
        ),
        compiler_params=pltpu.CompilerParams(
            dimension_semantics=("parallel", "parallel"),
            vmem_limit_bytes=vmem2,
        ),
    )(gate, x_flat)


# --------------------------------------------------------------------------
# Public wrapper
# --------------------------------------------------------------------------
def channel_attention(x, w1, w2, *, target_block_bytes=None, force_two_pass=False):
    """x: (B, C, H, W) NCHW.  w1: (C//r, C), w2: (C, C//r) 1x1 conv weights (no bias)."""
    B, C, H, W = x.shape
    HW = H * W
    dtype_bytes = jnp.dtype(x.dtype).itemsize
    per_img_bytes = C * HW * dtype_bytes

    vmem_cap = _tpu_vmem_capacity_bytes()
    # Leave headroom for Mosaic internal scratch: never request more than this.
    vmem_budget = max(24 << 20, min(vmem_cap - (16 << 20), int(vmem_cap * 0.75)))
    if target_block_bytes is None:
        # 2x double-buffered input + 2x output + temps must fit the budget
        # (v6e/v5e -> ~16 MiB blocks, v7x -> ~8 MiB blocks).
        target_block_bytes = max(2 << 20, vmem_budget // 6)

    num_tc = _num_tensorcores()

    # Free layout ops: collapse trailing spatial dims; no padding / slicing.
    x_flat = x.reshape(B, C, HW)
    # Weights pre-transposed (C stays on lanes for the in-kernel matmuls) and
    # pre-cast to f32 so no per-grid-step convert/relayout is needed.
    w1t = jnp.asarray(w1, jnp.float32).T               # (C, Cr)
    w2t = jnp.asarray(w2, jnp.float32).T               # (Cr, C)
    weight_bytes = (w1t.size + w2t.size) * 4

    use_two_pass = force_two_pass or per_img_bytes > target_block_bytes
    if use_two_pass:
        out_flat = _two_pass(
            x_flat, w1t, w2t,
            target_block_bytes=target_block_bytes,
            vmem_budget=vmem_budget,
            weight_bytes=weight_bytes,
        )
    else:
        out_flat = _single_pass(
            x_flat, w1t, w2t,
            target_block_bytes=target_block_bytes,
            vmem_budget=vmem_budget,
            num_tc=num_tc,
            weight_bytes=weight_bytes,
        )
    return out_flat.reshape(B, C, H, W)


def channel_attention_ref(x, w1, w2):
    """Pure-JAX reference matching the PyTorch forward."""
    avg = jnp.mean(x, axis=(2, 3), keepdims=True)      # (B, C, 1, 1)
    mx = jnp.max(x, axis=(2, 3), keepdims=True)        # (B, C, 1, 1)

    def mlp(p):
        h = jnp.maximum(jnp.einsum("rc,bcij->brij", w1, p), 0.0)
        return jnp.einsum("cr,brij->bcij", w2, h)

    gate = jax.nn.sigmoid(mlp(avg) + mlp(mx))
    return gate * x


if __name__ == "__main__":
    key = jax.random.PRNGKey(0)
    kx, k1, k2, kx2, k3, k4 = jax.random.split(key, 6)

    # --- main shape: single-pass path, lane-dense HW (16*16 = 256) ---
    B, C, H, W = 2, 64, 16, 16
    Cr = C // 16
    x = jax.random.normal(kx, (B, C, H, W), dtype=jnp.float32)
    w1 = jax.random.normal(k1, (Cr, C), dtype=jnp.float32) * 0.1
    w2 = jax.random.normal(k2, (C, Cr), dtype=jnp.float32) * 0.1

    out = channel_attention(x, w1, w2)
    jax.block_until_ready(out)
    ref = channel_attention_ref(x, w1, w2)
    assert out.shape == x.shape
    assert jnp.allclose(out, ref, atol=1e-5, rtol=1e-5), "single-pass mismatch"

    # --- ragged HW (63 lanes, not a multiple of 128) + ragged batch grid ---
    B2, C2, H2, W2 = 3, 32, 7, 9
    Cr2 = C2 // 8
    x2 = jax.random.normal(kx2, (B2, C2, H2, W2), dtype=jnp.float32)
    w1b = jax.random.normal(k3, (Cr2, C2), dtype=jnp.float32) * 0.1
    w2b = jax.random.normal(k4, (C2, Cr2), dtype=jnp.float32) * 0.1
    out2 = channel_attention(x2, w1b, w2b, target_block_bytes=2 * C2 * H2 * W2 * 4)
    ref2 = channel_attention_ref(x2, w1b, w2b)
    assert jnp.allclose(out2, ref2, atol=1e-5, rtol=1e-5), "ragged single-pass mismatch"

    # --- two-pass path: HW-tiled reduction (masked ragged tile) + tiled apply ---
    B3, C3, H3, W3 = 2, 32, 13, 13
    Cr3 = C3 // 8
    x3 = jax.random.normal(kx, (B3, C3, H3, W3), dtype=jnp.float32)
    w1c = jax.random.normal(k1, (Cr3, C3), dtype=jnp.float32) * 0.1
    w2c = jax.random.normal(k2, (C3, Cr3), dtype=jnp.float32) * 0.1
    out3 = channel_attention(x3, w1c, w2c, target_block_bytes=16 * 1024,
                             force_two_pass=True)
    ref3 = channel_attention_ref(x3, w1c, w2c)
    assert jnp.allclose(out3, ref3, atol=1e-5, rtol=1e-5), "two-pass mismatch"

    jax.block_until_ready((out, out2, out3))
    print("KERNEL_OK")
</pallas_src>

<mosaic_0001>
module attributes {stable_mosaic.version = 11 : i64} {
  func.func @_ca_fused_kernel(%arg0: i32, %arg1: memref<2x64x256xf32, #tpu.memory_space<vmem>>, %arg2: memref<64x4xf32, #tpu.memory_space<vmem>>, %arg3: memref<4x64xf32, #tpu.memory_space<vmem>>, %arg4: memref<2x64x256xf32, #tpu.memory_space<vmem>>) attributes {dimension_semantics = [#tpu.dimension_semantics<parallel>], iteration_bounds = array<i64: 1>, scalar_prefetch = 0 : i64, scratch_operands = 0 : i64, tpu.core_type = #tpu.core_type<tc>, window_params = [{transform_indices = @transform_0, window_bounds = array<i64: 2, 64, 256>}, {pipeline_mode = #tpu.pipeline_mode<synchronous>, transform_indices = @transform_1, window_bounds = array<i64: 64, 4>}, {pipeline_mode = #tpu.pipeline_mode<synchronous>, transform_indices = @transform_2, window_bounds = array<i64: 4, 64>}, {transform_indices = @transform_3, window_bounds = array<i64: 2, 64, 256>}]} {
    %c0 = arith.constant 0 : index
    %c0_0 = arith.constant 0 : index
    %c0_1 = arith.constant 0 : index
    %0 = vector.load %arg1[%c0, %c0_0, %c0_1] : memref<2x64x256xf32, #tpu.memory_space<vmem>>, vector<2x64x256xf32>
    %cst = arith.constant dense<0.000000e+00> : vector<2x64xf32>
    %1 = vector.multi_reduction <add>, %0, %cst [2] : vector<2x64x256xf32> to vector<2x64xf32>
    %cst_2 = arith.constant 3.906250e-03 : f32
    %2 = vector.broadcast %cst_2 : f32 to vector<2x64xf32>
    %3 = arith.mulf %1, %2 : vector<2x64xf32>
    %cst_3 = arith.constant dense<0xFF800000> : vector<2x64xf32>
    %4 = vector.multi_reduction <maximumf>, %0, %cst_3 [2] : vector<2x64x256xf32> to vector<2x64xf32>
    %c0_4 = arith.constant 0 : index
    %c0_5 = arith.constant 0 : index
    %5 = vector.load %arg2[%c0_4, %c0_5] : memref<64x4xf32, #tpu.memory_space<vmem>>, vector<64x4xf32>
    %c0_6 = arith.constant 0 : index
    %c0_7 = arith.constant 0 : index
    %6 = vector.load %arg3[%c0_6, %c0_7] : memref<4x64xf32, #tpu.memory_space<vmem>>, vector<4x64xf32>
    %cst_8 = arith.constant dense<0.000000e+00> : vector<2x4xf32>
    %7 = tpu.matmul %3, %5, %cst_8 {dimension_numbers = #tpu.dot_dimension_numbers<[1], [0], [0], [1], [0, 0, 1, 1], [], []>} : vector<2x64xf32>, vector<64x4xf32>, vector<2x4xf32> -> vector<2x4xf32>
    %cst_9 = arith.constant 0.000000e+00 : f32
    %8 = vector.broadcast %cst_9 : f32 to vector<2x4xf32>
    %9 = arith.maximumf %7, %8 : vector<2x4xf32>
    %cst_10 = arith.constant dense<0.000000e+00> : vector<2x64xf32>
    %10 = tpu.matmul %9, %6, %cst_10 {dimension_numbers = #tpu.dot_dimension_numbers<[1], [0], [0], [1], [0, 0, 1, 1], [], []>} : vector<2x4xf32>, vector<4x64xf32>, vector<2x64xf32> -> vector<2x64xf32>
    %cst_11 = arith.constant dense<0.000000e+00> : vector<2x4xf32>
    %11 = tpu.matmul %4, %5, %cst_11 {dimension_numbers = #tpu.dot_dimension_numbers<[1], [0], [0], [1], [0, 0, 1, 1], [], []>} : vector<2x64xf32>, vector<64x4xf32>, vector<2x4xf32> -> vector<2x4xf32>
    %cst_12 = arith.constant 0.000000e+00 : f32
    %12 = vector.broadcast %cst_12 : f32 to vector<2x4xf32>
    %13 = arith.maximumf %11, %12 : vector<2x4xf32>
    %cst_13 = arith.constant dense<0.000000e+00> : vector<2x64xf32>
    %14 = tpu.matmul %13, %6, %cst_13 {dimension_numbers = #tpu.dot_dimension_numbers<[1], [0], [0], [1], [0, 0, 1, 1], [], []>} : vector<2x4xf32>, vector<4x64xf32>, vector<2x64xf32> -> vector<2x64xf32>
    %15 = arith.addf %10, %14 : vector<2x64xf32>
    %16 = arith.negf %15 : vector<2x64xf32>
    %17 = math.exp %16 : vector<2x64xf32>
    %cst_14 = arith.constant 1.000000e+00 : f32
    %18 = vector.broadcast %cst_14 : f32 to vector<2x64xf32>
    %19 = arith.addf %18, %17 : vector<2x64xf32>
    %20 = arith.divf %18, %19 : vector<2x64xf32>
    %21 = vector.shape_cast %20 : vector<2x64xf32> to vector<2x64x1xf32>
    %22 = vector.broadcast %21 : vector<2x64x1xf32> to vector<2x64x256xf32>
    %23 = arith.mulf %22, %0 : vector<2x64x256xf32>
    %c0_15 = arith.constant 0 : index
    %c0_16 = arith.constant 0 : index
    %c0_17 = arith.constant 0 : index
    %24 = vector.load %arg4[%c0_15, %c0_16, %c0_17] : memref<2x64x256xf32, #tpu.memory_space<vmem>>, vector<2x64x256xf32>
    tpu.vector_store %arg4[%c0_15, %c0_16, %c0_17], %23 {strides = array<i32>} : memref<2x64x256xf32, #tpu.memory_space<vmem>>, vector<2x64x256xf32>,
    return
  }
  func.func @transform_0(%arg0: i32) -> (i32, i32, i32) {
    %c0_i32 = arith.constant 0 : i32
    %c0_i32_0 = arith.constant 0 : i32
    %c0_i32_1 = arith.constant 0 : i32
    return %arg0, %c0_i32, %c0_i32_0 : i32, i32, i32
  }
  func.func @transform_1(%arg0: i32) -> (i32, i32) {
    %c0_i32 = arith.constant 0 : i32
    %c0_i32_0 = arith.constant 0 : i32
    %c0_i32_1 = arith.constant 0 : i32
    return %c0_i32, %c0_i32_0 : i32, i32
  }
  func.func @transform_2(%arg0: i32) -> (i32, i32) {
    %c0_i32 = arith.constant 0 : i32
    %c0_i32_0 = arith.constant 0 : i32
    %c0_i32_1 = arith.constant 0 : i32
    return %c0_i32, %c0_i32_0 : i32, i32
  }
  func.func @transform_3(%arg0: i32) -> (i32, i32, i32) {
    %c0_i32 = arith.constant 0 : i32
    %c0_i32_0 = arith.constant 0 : i32
    %c0_i32_1 = arith.constant 0 : i32
    return %arg0, %c0_i32, %c0_i32_0 : i32, i32, i32
  }
}

</mosaic_0001>

<bundles_post_ra>
// kernel: tpu_custom_call.1
= control target key start
LH: loop header
LB: loop body
LE: loop exit
PB: predicated region body
PF: predicated region fallthrough
CT: control target
= control target key end

     0   :  { %8 = vsyncpa [#allocation3], 0  ;;  %s1022_s0 = inlined_call_operand.hbm [shape: f32[2,64,256], index: 0, kind: input, shape index: {}]   ;;  %s1023_s1 = inlined_call_operand.vmem [shape: f32[64,4], index: 1, kind: input, shape index: {}]   ;;  %s1024_s2 = inlined_call_operand.vmem [shape: f32[4,64], index: 2, kind: input, shape index: {}]   ;;  %s1025_s3 = inlined_call_operand.hbm [shape: f32[2,64,256], index: 3, kind: output, shape index: {}]  }
   0x1   :  { %9 = vsyncpa [#allocation4], 0  ;;  %s14_s14 = sshll.u32 %s1022_s0, 4  ;;  %s677_s15 = smov [#allocation2]   ;;  %s15_s14 = int_to_ptr.hbm [resolvable:$true] %s14_s14 }
   0x2   :  { %s16_s16 = sshll.u32 %s677_s15, 4  ;;  %s678_s17 = smov 256   ;;  %s17_s16 = int_to_ptr.vmem [resolvable:$true] %s16_s16 }
   0x3   :  { %s679_s18 = smov 16  }
   0x4   :  { %22 = dma.hbm_to_vmem [thread:$0]  %s15_s14, 4096, %s17_s16, [#allocation3], %s678_s17, %s678_s17, %s679_s18  }
   0x5   :  { %673 = dma.done.wait [#allocation3], 4096  }
   0x6   :  { %674 = vsyncadd [#allocation3], 4294963200  ;;  %v707_v0 = vld [vmem:[#allocation2 + $0x80] sm:$0xff]  ;;  %v709_v1 = vld [vmem:[#allocation2 + $0x88] sm:$0xff]  ;;  %vm205_vm0 = vcmask 130112   ;;  %vm209_vm1 = vcmask 195712  }
   0x7   :  { %v711_v2 = vld [vmem:[#allocation2 + $0x20] sm:$0xff]  ;;  %v87_v3 = vadd.f32 %v709_v1, %v707_v0  ;;  %v715_v4 = vld [vmem:[#allocation2 + $0x28] sm:$0xff]  ;;  %v725_v9 = vld [vmem:[#allocation2 + $0x90] sm:$0xff]  ;;  %v151_v25 = vmax.f32 %v707_v0, %v709_v1  ;;  %vm213_vm2 = vcmask 261312   ;;  %vm217_vm3 = vcmask 326912   ;;  %s580_s11 = sshll.u32 %s1025_s3, 4  ;;  %s581_s11 = int_to_ptr.hbm [resolvable:$true] %s580_s11 }
   0x8   :  { %v717_v5 = vld [vmem:[#allocation2] sm:$0xff]  ;;  %v719_v6 = vld [vmem:[#allocation2 + $0x8] sm:$0xff]  ;;  %v69_v7 = vadd.f32 %v715_v4, %v711_v2  ;;  %v727_v10 = vld [vmem:[#allocation2 + $0x98] sm:$0xff]  ;;  %v133_v33 = vmax.f32 %v711_v2, %v715_v4  ;;  %vm221_vm4 = vcmask 392512   ;;  %vm225_vm5 = vcmask 458112  }
   0x9   :  { %v63_v8 = vadd.f32 %v719_v6, %v717_v5  ;;  %88 = vadd.xlane.f32.xlu1 %v87_v3  ;;  %v729_v11 = vld [vmem:[#allocation2 + $0xa0] sm:$0xff]  ;;  %v731_v12 = vld [vmem:[#allocation2 + $0xa8] sm:$0xff]  ;;  %v733_v13 = vld [vmem:[#allocation2 + $0x10] sm:$0xff]  ;;  %v90_v15 = vadd.f32 %v727_v10, %v725_v9  ;;  %v127_v23 = vmax.f32 %v717_v5, %v719_v6  ;;  %v154_v26 = vmax.f32 %v725_v9, %v727_v10 }
   0xa   :  { %70 = vadd.xlane.f32.xlu2 %v69_v7  ;;  %1037 = vst [vmem:[#allocation8_spill] sm:$0xff] %v729_v11  ;;  %v735_v14 = vld [vmem:[#allocation2 + $0x18] sm:$0xff]  ;;  %v93_v16 = vadd.f32 %v731_v12, %v729_v11  ;;  %v743_v18 = vld [vmem:[#allocation2 + $0xb0] sm:$0xff]  ;;  %v763_v28 = vld [vmem:[#allocation2 + $0xc0] sm:$0xff]  ;;  %v157_v41 = vmax.f32 %v729_v11, %v731_v12  ;;  %vm229_vm6 = vcmask 523712   ;;  %vm246_vm7 = vcmask 1041409  }
   0xb   :  { %64 = vadd.xlane.f32.xlu0 %v63_v8  ;;  %1038 = vst [vmem:[#allocation9_spill] sm:$0xff] %v731_v12  ;;  %v66_v17 = vadd.f32 %v735_v14, %v733_v13  ;;  %v745_v19 = vld [vmem:[#allocation2 + $0xb8] sm:$0xff]  ;;  %v747_v20 = vld [vmem:[#allocation2 + $0x30] sm:$0xff]  ;;  %v130_v27 = vmax.f32 %v733_v13, %v735_v14  ;;  %v765_v29 = vld [vmem:[#allocation2 + $0xc8] sm:$0xff]  ;;  %vm248_vm8 = vcmask 523264   ;;  %vm346_vm9 = vcmask 1043456  }
   0xc   :  { %1039 = vst [vmem:[#allocation10_spill] sm:$0xff] %v743_v18  ;;  %v749_v21 = vld [vmem:[#allocation2 + $0x38] sm:$0xff]  ;;  %v96_v22 = vadd.f32 %v745_v19, %v743_v18  ;;  %v767_v30 = vld [vmem:[#allocation2 + $0x40] sm:$0xff]  ;;  %v769_v31 = vld [vmem:[#allocation2 + $0x48] sm:$0xff]  ;;  %v99_v32 = vadd.f32 %v765_v29, %v763_v28  ;;  %v160_v44 = vmax.f32 %v743_v18, %v745_v19  ;;  %v163_v50 = vmax.f32 %v763_v28, %v765_v29 }
   0xd   :  { %1040 = vst [vmem:[#allocation11_spill] sm:$0xff] %v745_v19  ;;  %v72_v24 = vadd.f32 %v749_v21, %v747_v20  ;;  %v75_v34 = vadd.f32 %v769_v31, %v767_v30  ;;  %v777_v35 = vld [vmem:[#allocation2 + $0x50] sm:$0xff]  ;;  %v779_v36 = vld [vmem:[#allocation2 + $0x58] sm:$0xff]  ;;  %v791_v42 = vld [vmem:[#allocation2 + $0x60] sm:$0xff]  ;;  %v136_v46 = vmax.f32 %v747_v20, %v749_v21  ;;  %v139_v49 = vmax.f32 %v767_v30, %v769_v31 }
   0xe   :  { %1041 = vst [vmem:[#allocation12_spill] sm:$0xff] %v763_v28  ;;  %v781_v37 = vld [vmem:[#allocation2 + $0xd0] sm:$0xff]  ;;  %v783_v38 = vld [vmem:[#allocation2 + $0xd8] sm:$0xff]  ;;  %v78_v39 = vadd.f32 %v779_v36, %v777_v35  ;;  %v793_v43 = vld [vmem:[#allocation2 + $0x68] sm:$0xff]  ;;  %v142_v57 = vmax.f32 %v777_v35, %v779_v36  ;;  %vm342_vm10 = vcmask 31744  }
   0xf   :  { %1042 = vst [vmem:[#allocation13_spill] sm:$0xff] %v765_v29  ;;  %v102_v40 = vadd.f32 %v783_v38, %v781_v37  ;;  %v81_v45 = vadd.f32 %v793_v43, %v791_v42  ;;  %v801_v47 = vld [vmem:[#allocation2 + $0xe0] sm:$0xff]  ;;  %v803_v48 = vld [vmem:[#allocation2 + $0xe8] sm:$0xff]  ;;  %v811_v52 = vld [vmem:[#allocation2 + $0xf0] sm:$0xff]  ;;  %v145_v59 = vmax.f32 %v791_v42, %v793_v43  ;;  %v166_v60 = vmax.f32 %v781_v37, %v783_v38 }
  0x10   :  { %1043 = vst [vmem:[#allocation14_spill] sm:$0xff] %v801_v47  ;;  %v105_v51 = vadd.f32 %v803_v48, %v801_v47  ;;  %v813_v53 = vld [vmem:[#allocation2 + $0xf8] sm:$0xff]  ;;  %v815_v54 = vld [vmem:[#allocation2 + $0x70] sm:$0xff]  ;;  %v169_v61 = vmax.f32 %v801_v47, %v803_v48 }
  0x11   :  { %91 = vadd.xlane.f32.xlu1 %v90_v15  ;;  %1044 = vst [vmem:[#allocation15_spill] sm:$0xff] %v803_v48  ;;  %v817_v55 = vld [vmem:[#allocation2 + $0x78] sm:$0xff]  ;;  %v108_v56 = vadd.f32 %v813_v53, %v811_v52  ;;  %v172_v62 = vmax.f32 %v811_v52, %v813_v53 }
  0x12   :  { %94 = vadd.xlane.f32.xlu2 %v93_v16  ;;  %1045 = vst [vmem:[#allocation16_spill] sm:$0xff] %v811_v52  ;;  %v84_v58 = vadd.f32 %v817_v55, %v815_v54  ;;  %v148_v63 = vmax.f32 %v815_v54, %v817_v55 }
  0x13   :  { %67 = vadd.xlane.f32.xlu0 %v66_v17  ;;  %1046 = vst [vmem:[#allocation17_spill] sm:$0xff] %v813_v53 }
  0x19   :  { %97 = vadd.xlane.f32.xlu1 %v96_v22 }
  0x1a   :  { %128 = vmax.xlane.f32.xlu2 %v127_v23 }
  0x1b   :  { %73 = vadd.xlane.f32.xlu0 %v72_v24 }
  0x21   :  { %152 = vmax.xlane.f32.xlu1 %v151_v25  ;;  %v182_v25 = vld [vmem:[%s1023_s1 + $0x38] sm:$0xff] }
  0x22   :  { %155 = vmax.xlane.f32.xlu2 %v154_v26  ;;  %259 = vmatpush.msra.mxu0 %v182_v25 }
  0x23   :  { %131 = vmax.xlane.f32.xlu0 %v130_v27  ;;  %329 = vmatpush.msra.mxu1 %v182_v25 }
  0x29   :  { %100 = vadd.xlane.f32.xlu1 %v99_v32 }
  0x2a   :  { %134 = vmax.xlane.f32.xlu2 %v133_v33  ;;  %v181_v33 = vld [vmem:[%s1023_s1 + $0x30] sm:$0xff] }
  0x2b   :  { %76 = vadd.xlane.f32.xlu0 %v75_v34  ;;  %260 = vmatpush.msra.mxu0 %v181_v33  ;;  %v180_v34 = vld [vmem:[%s1023_s1 + $0x28] sm:$0xff] }
  0x2c   :  { %330 = vmatpush.msra.mxu1 %v181_v33 }
  0x2d   :  { %261 = vmatpush.msra.mxu0 %v180_v34 }
  0x2e   :  { %331 = vmatpush.msra.mxu1 %v180_v34 }
  0x31   :  { %79 = vadd.xlane.f32.xlu1 %v78_v39  ;;  %v179_v39 = vld [vmem:[%s1023_s1 + $0x20] sm:$0xff] }
  0x32   :  { %103 = vadd.xlane.f32.xlu2 %v102_v40  ;;  %v178_v40 = vld [vmem:[%s1023_s1 + $0x18] sm:$0xff]  ;;  %262 = vmatpush.msra.mxu0 %v179_v39 }
  0x33   :  { %158 = vmax.xlane.f32.xlu0 %v157_v41  ;;  %332 = vmatpush.msra.mxu1 %v179_v39 }
  0x34   :  { %263 = vmatpush.msra.mxu0 %v178_v40 }
  0x35   :  { %333 = vmatpush.msra.mxu1 %v178_v40 }
  0x39   :  { %161 = vmax.xlane.f32.xlu1 %v160_v44 }
  0x3a   :  { %82 = vadd.xlane.f32.xlu2 %v81_v45 }
  0x3b   :  { %137 = vmax.xlane.f32.xlu0 %v136_v46  ;;  %v177_v46 = vld [vmem:[%s1023_s1 + $0x10] sm:$0xff] }
  0x3c   :  { %264 = vmatpush.msra.mxu0 %v177_v46  ;;  %334 = vmatpush.msra.mxu1 %v177_v46 }
  0x41   :  { %140 = vmax.xlane.f32.xlu1 %v139_v49  ;;  %v176_v49 = vld [vmem:[%s1023_s1 + $0x8] sm:$0xff] }
  0x42   :  { %164 = vmax.xlane.f32.xlu2 %v163_v50  ;;  %v175_v50 = vld [vmem:[%s1023_s1] sm:$0xff]  ;;  %265 = vmatpush.msra.mxu0 %v176_v49 }
  0x43   :  { %106 = vadd.xlane.f32.xlu0 %v105_v51  ;;  %335 = vmatpush.msra.mxu1 %v176_v49 }
  0x44   :  { %266 = vmatpush.msra.mxu0 %v175_v50 }
  0x45   :  { %336 = vmatpush.msra.mxu1 %v175_v50 }
  0x49   :  { %109 = vadd.xlane.f32.xlu1 %v108_v56 }
  0x4a   :  { %143 = vmax.xlane.f32.xlu2 %v142_v57 }
  0x4b   :  { %85 = vadd.xlane.f32.xlu0 %v84_v58  ;;  %v1026_v58 = vlaneseq }
  0x51   :  { %146 = vmax.xlane.f32.xlu1 %v145_v59 }
  0x52   :  { %170 = vmax.xlane.f32.xlu2 %v169_v61 }
  0x53   :  { %167 = vmax.xlane.f32.xlu0 %v166_v60 }
  0x59   :  { %173 = vmax.xlane.f32.xlu1 %v172_v62  ;;  %v878_v62 = vand.u32 127, %v1026_v58 }
  0x5b   :  { %149 = vmax.xlane.f32.xlu0 %v148_v63  ;;  %v881_v63 = vadd.s32 4294967288, %v878_v62  ;;  %v884_v39 = vadd.s32 4294967280, %v878_v62  ;;  %v888_v50 = vadd.s32 4294967272, %v878_v62  ;;  %v902_v28 = vadd.s32 4294967256, %v878_v62 }
  0x7c   :  { %v89_v3 = vpop.xlane.xlu1 %88 }
  0x7d   :  { %v835_v7 = vpop.xlane.xlu2 %70  ;;  %v119_v34 = vmul.f32 0.00390625, %v89_v3  ;;  %v894_v3 = vadd.s32 4294967264, %v878_v62 }
  0x7e   :  { %v65_v8 = vpop.xlane.xlu0 %64 }
  0x7f   :  { %v111_v40 = vmul.f32 0.00390625, %v65_v8  ;;  %v231_v52 = vperm.slane %v119_v34, %v878_v62 }
  0x81   :  { %v202_v47 = vperm.slane %v111_v40, %v878_v62 }
  0x84   :  { %v92_v15 = vpop.xlane.xlu1 %91 }
  0x85   :  { %v95_v16 = vpop.xlane.xlu2 %94  ;;  %v120_v25 = vmul.f32 0.00390625, %v92_v15 }
  0x86   :  { %v68_v17 = vpop.xlane.xlu0 %67  ;;  %v121_v49 = vmul.f32 0.00390625, %v95_v16 }
  0x87   :  { %v112_v33 = vmul.f32 0.00390625, %v68_v17  ;;  %v232_v46 = vperm.slane %v120_v25, %v881_v63  ;;  %v113_v25 = vmul.f32 0.00390625, %v835_v7  ;;  %v909_v7 = vadd.s32 4294967248, %v878_v62 }
  0x88   :  { %v234_v19 = vperm.slane %v121_v49, %v884_v39 }
  0x89   :  { %v204_v53 = vperm.slane %v112_v33, %v881_v63 }
  0x8b   :  { %v206_v11 = vsel %vm205_vm0, %v204_v53, %v202_v47  ;;  %v917_v47 = vadd.s32 4294967240, %v878_v62 }
  0x8c   :  { %v98_v22 = vpop.xlane.xlu1 %97 }
  0x8d   :  { %v837_v23 = vpop.xlane.xlu2 %128  ;;  %v122_v15 = vmul.f32 0.00390625, %v98_v22  ;;  %v233_v22 = vsel %vm205_vm0, %v232_v46, %v231_v52 }
  0x8e   :  { %v74_v24 = vpop.xlane.xlu0 %73  ;;  %v235_v53 = vsel %vm209_vm1, %v234_v19, %v233_v22 }
  0x8f   :  { %v114_v16 = vmul.f32 0.00390625, %v74_v24  ;;  %v236_v34 = vperm.slane %v122_v15, %v888_v50 }
  0x91   :  { %v237_v15 = vsel %vm213_vm2, %v236_v34, %v235_v53 }
  0x94   :  { %v842_v26 = vpop.xlane.xlu1 %152 }
  0x95   :  { %v844_v27 = vpop.xlane.xlu2 %155 }
  0x96   :  { %v846_v32 = vpop.xlane.xlu0 %131 }
  0x9c   :  { %v101_v41 = vpop.xlane.xlu1 %100 }
  0x9d   :  { %v860_v44 = vpop.xlane.xlu2 %134  ;;  %v123_v48 = vmul.f32 0.00390625, %v101_v41  ;;  %v208_v41 = vperm.slane %v113_v25, %v884_v39 }
  0x9e   :  { %v77_v45 = vpop.xlane.xlu0 %76 }
  0x9f   :  { %v115_v29 = vmul.f32 0.00390625, %v77_v45  ;;  %v212_v45 = vperm.slane %v114_v16, %v888_v50  ;;  %v210_v40 = vsel %vm209_vm1, %v208_v41, %v206_v11 }
  0xa1   :  { %v216_v52 = vperm.slane %v115_v29, %v894_v3  ;;  %v214_v16 = vsel %vm213_vm2, %v212_v45, %v210_v40 }
  0xa3   :  { %v218_v11 = vsel %vm217_vm3, %v216_v52, %v214_v16  ;;  %v303_v52 = vperm.slane %v842_v26, %v878_v62  ;;  %v289_v26 = vperm.slane %v846_v32, %v881_v63 }
  0xa4   :  { %v80_v51 = vpop.xlane.xlu1 %79 }
  0xa5   :  { %v104_v56 = vpop.xlane.xlu2 %103  ;;  %v116_v18 = vmul.f32 0.00390625, %v80_v51 }
  0xa6   :  { %v871_v57 = vpop.xlane.xlu0 %158  ;;  %v124_v33 = vmul.f32 0.00390625, %v104_v56  ;;  %v238_v56 = vperm.slane %v123_v48, %v894_v3 }
  0xa7   :  { %v306_v40 = vperm.slane %v871_v57, %v884_v39  ;;  %v291_v57 = vperm.slane %v860_v44, %v884_v39 }
  0xa8   :  { %v240_v51 = vperm.slane %v124_v33, %v902_v28  ;;  %v239_v33 = vsel %vm217_vm3, %v238_v56, %v237_v15  ;;  %v288_v15 = vperm.slane %v837_v23, %v878_v62 }
  0xaa   :  { %v290_v62 = vsel %vm205_vm0, %v289_v26, %v288_v15 }
  0xab   :  { %v292_v39 = vsel %vm209_vm1, %v291_v57, %v290_v62 }
  0xac   :  { %v873_v59 = vpop.xlane.xlu1 %161 }
  0xad   :  { %v83_v60 = vpop.xlane.xlu2 %82 }
  0xae   :  { %v875_v61 = vpop.xlane.xlu0 %137  ;;  %v117_v24 = vmul.f32 0.00390625, %v83_v60  ;;  %v220_v60 = vperm.slane %v116_v18, %v902_v28  ;;  %v241_v18 = vsel %vm221_vm4, %v240_v51, %v239_v33  ;;  %v304_v51 = vperm.slane %v844_v27, %v881_v63 }
  0xaf   :  { %v293_v16 = vperm.slane %v875_v61, %v888_v50 }
  0xb0   :  { %v224_v48 = vperm.slane %v117_v24, %v909_v7  ;;  %v222_v22 = vsel %vm221_vm4, %v220_v60, %v218_v11 }
  0xb1   :  { %v294_v61 = vsel %vm213_vm2, %v293_v16, %v292_v39 }
  0xb2   :  { %v226_v41 = vsel %vm225_vm5, %v224_v48, %v222_v22  ;;  %v305_v48 = vsel %vm205_vm0, %v304_v51, %v303_v52  ;;  %v1047_v52 = vlaneseq }
  0xb4   :  { %v890_v58 = vpop.xlane.xlu1 %140  ;;  %v414_v51 = vshrl.u32 %v1047_v52, 7 }
  0xb5   :  { %v896_v17 = vpop.xlane.xlu2 %164  ;;  %v295_v32 = vperm.slane %v890_v58, %v894_v3 }
  0xb6   :  { %v107_v8 = vpop.xlane.xlu0 %106  ;;  %v310_v27 = vperm.slane %v896_v17, %v894_v3  ;;  %604 = vset.pattern.permute.xlu2 %v414_v51  ;;  %v433_v39 = vadd.s32 24, %v414_v51 }
  0xb7   :  { %v125_v12 = vmul.f32 0.00390625, %v107_v8  ;;  %v296_v11 = vsel %vm217_vm3, %v295_v32, %v294_v61  ;;  %v439_v61 = vadd.s32 32, %v414_v51 }
  0xb9   :  { %v242_v46 = vperm.slane %v125_v12, %v909_v7 }
  0xbb   :  { %v243_v24 = vsel %vm225_vm5, %v242_v46, %v241_v18  ;;  %v308_v46 = vperm.slane %v873_v59, %v888_v50  ;;  %v307_v59 = vsel %vm209_vm1, %v306_v40, %v305_v48  ;;  %v421_v40 = vadd.s32 8, %v414_v51 }
  0xbc   :  { %v110_v49 = vpop.xlane.xlu1 %109 }
  0xbd   :  { %v126_v29 = vmul.f32 0.00390625, %v110_v49  ;;  %v144_v8 = vpop.xlane.xlu2 %143  ;;  %v309_v23 = vsel %vm213_vm2, %v308_v46, %v307_v59  ;;  %605 = vset.pattern.permute.xlu0 %v421_v40 }
  0xbe   :  { %v86_v25 = vpop.xlane.xlu0 %85  ;;  %v311_v63 = vsel %vm217_vm3, %v310_v27, %v309_v23  ;;  %v297_v17 = vperm.slane %v144_v8, %v902_v28 }
  0xbf   :  { %v118_v19 = vmul.f32 0.00390625, %v86_v25  ;;  %v244_v12 = vperm.slane %v126_v29, %v917_v47 }
  0xc0   :  { %v298_v18 = vsel %vm221_vm4, %v297_v17, %v296_v11 }
  0xc1   :  { %v228_v34 = vperm.slane %v118_v19, %v917_v47  ;;  %v245_v45 = vsel %vm229_vm6, %v244_v12, %v243_v24  ;;  %v183_v24 = vld [vmem:[%s1024_s2] sm:$0xf]  ;;  %s680_s2 = smov [#allocation5]  }
  0xc2   :  { %597 = vmatpush.msk.msra.mxu3 %vm346_vm9, %v183_v24  ;;  %595 = vmatpush.msk.msra.mxu2 %vm346_vm9, %v183_v24  ;;  %s578_s8 = sshll.u32 %s680_s2, 4  ;;  %s579_s8 = int_to_ptr.vmem [resolvable:$true] %s578_s8 }
  0xc3   :  { %v230_v56 = vsel %vm229_vm6, %v228_v34, %v226_v41 }
  0xc4   :  { %v247_v53 = vsel %vm246_vm7, %v245_v45, %v230_v56  ;;  %v147_v60 = vpop.xlane.xlu1 %146 }
  0xc5   :  { %593 = vmatmul.msk.f32.vlgmr.msra.gmra.mxu0 %vm248_vm8, %v247_v53  ;;  %v171_v25 = vpop.xlane.xlu2 %170  ;;  %v299_v33 = vperm.slane %v147_v60, %v909_v7  ;;  %v427_v53 = vadd.s32 16, %v414_v51 }
  0xc6   :  { %v168_v49 = vpop.xlane.xlu0 %167  ;;  %v314_v44 = vperm.slane %v171_v25, %v909_v7 }
  0xc7   :  { %v312_v29 = vperm.slane %v168_v49, %v902_v28  ;;  %v300_v12 = vsel %vm225_vm5, %v299_v33, %v298_v18  ;;  %606 = vset.pattern.permute.xlu1 %v427_v53 }
  0xc9   :  { %v313_v19 = vsel %vm221_vm4, %v312_v29, %v311_v63 }
  0xca   :  { %v315_v28 = vsel %vm225_vm5, %v314_v44, %v313_v19  ;;  %v445_v44 = vadd.s32 40, %v414_v51  ;;  %v457_v19 = vadd.s32 56, %v414_v51 }
  0xcc   :  { %v174_v50 = vpop.xlane.xlu1 %173 }
  0xcd   :  { %v316_v58 = vperm.slane %v174_v50, %v917_v47  ;;  %v451_v50 = vadd.s32 48, %v414_v51 }
  0xce   :  { %v150_v3 = vpop.xlane.xlu0 %149 }
  0xcf   :  { %v301_v8 = vperm.slane %v150_v3, %v917_v47  ;;  %v317_v7 = vsel %vm229_vm6, %v316_v58, %v315_v28 }
  0xd1   :  { %v302_v22 = vsel %vm229_vm6, %v301_v8, %v300_v12 }
  0xd2   :  { %v318_v34 = vsel %vm246_vm7, %v317_v7, %v302_v22 }
  0xd3   :  { %594 = vmatmul.msk.f32.vlgmr.msra.gmra.mxu1 %vm248_vm8, %v318_v34 }
 0x142   :  { %v268_v41 = vpop.f32.mrf.mxu0 }
 0x143   :  { %v271_v47 = vmax.f32 %v268_v41, 0.0 }
 0x145   :  { %598 = vmatmul.msk.f32.vlgmr.msra.gmra.mxu3 %vm342_vm10, %v271_v47 }
 0x150   :  { %v338_v45 = vpop.f32.mrf.mxu1 }
 0x151   :  { %v341_v56 = vmax.f32 %v338_v45, 0.0 }
 0x153   :  { %596 = vmatmul.msk.f32.vlgmr.msra.gmra.mxu2 %vm342_vm10, %v341_v56 }
 0x1c8   :  { %v390_v60 = vpop.f32.mrf.mxu3 }
 0x1d6   :  { %v367_v46 = vpop.f32.mrf.mxu2 }
 0x1d7   :  { %v391_v49 = vadd.f32 %v390_v60, %v367_v46  ;;  %v1049_v60 = vld [vmem:[#allocation9_spill] sm:$0xff] }
 0x1d9   :  { %v599_v15 = vmul.f32 -1.442695, %v391_v49  ;;  %v1051_v49 = vld [vmem:[#allocation11_spill] sm:$0xff] }
 0x1db   :  { %621 = vpow2.f32 %v599_v15 }
 0x1e1   :  { %v622_v26 = vpop.eup %621 }
 0x1e2   :  { %v396_v27 = vadd.f32 1.0, %v622_v26 }
 0x1e4   :  { %623 = vrcp.f32 %v396_v27  ;;  %v408_v25 = vand.u32 2147483648, %v396_v27  ;;  %v406_v16 = vand.u32 2147483647, %v396_v27  ;;  %vm402_vm12 = vweird.f32 %v396_v27 }
 0x1e6   :  { %v409_v32 = vor.u32 1.1754944e-38, %v408_v25  ;;  %vm407_vm14 = vcmp.eq.f32.partialorder %v406_v16, 8.507059e+37 }
 0x1ea   :  { %v624_v48 = vpop.eup %623 }
 0x1eb   :  { %v398_v57 = vmul.f32 %v624_v48, %v396_v27  ;;  %vm403_vm11 = vweird.f32 %v624_v48 }
 0x1ec   :  { %vm404_vm13 = vmor %vm402_vm12, %vm403_vm11 }
 0x1ed   :  { %v399_v29 = vsub.f32 1.0, %v398_v57 }
 0x1ef   :  { %v400_v59 = vmul.f32 %v624_v48, %v399_v29  ;;  %v1054_v29 = vld [vmem:[#allocation14_spill] sm:$0xff] }
 0x1f1   :  { %v401_v23 = vadd.f32 %v624_v48, %v400_v59  ;;  %v1055_v59 = vld [vmem:[#allocation15_spill] sm:$0xff] }
 0x1f3   :  { %v405_v62 = vsel %vm404_vm13, %v624_v48, %v401_v23 }
 0x1f4   :  { %v410_v63 = vsel %vm407_vm14, %v409_v32, %v405_v62  ;;  %v1056_v32 = vld [vmem:[#allocation16_spill] sm:$0xff] }
 0x1f5   :  { %v412_v17 = vperm.slane %v410_v63, 0  ;;  %v461_v33 = vperm.slane %v410_v63, 1  ;;  %v1057_v63 = vld [vmem:[#allocation17_spill] sm:$0xff] }
 0x1f7   :  { %429 = vperm.xlu1 %606, %v412_v17   ;;  %423 = vperm.xlu0 %605, %v412_v17  }
 0x1f8   :  { %417 = vperm.xlu2 %604, %v412_v17  }
 0x1ff   :  { %609 = vset.pattern.permute.xlu1 %v445_v44  ;;  %612 = vset.pattern.permute.xlu0 %v414_v51 }
 0x200   :  { %607 = vset.pattern.permute.xlu2 %v433_v39 }
 0x207   :  { %447 = vperm.xlu1 %609, %v412_v17   ;;  %466 = vperm.xlu0 %612, %v461_v33  }
 0x208   :  { %435 = vperm.xlu2 %607, %v412_v17  }
 0x20f   :  { %611 = vset.pattern.permute.xlu1 %v457_v19  ;;  %617 = vset.pattern.permute.xlu0 %v445_v44 }
 0x210   :  { %608 = vset.pattern.permute.xlu2 %v439_v61 }
 0x217   :  { %459 = vperm.xlu1 %611, %v412_v17   ;;  %496 = vperm.xlu0 %617, %v461_v33  }
 0x218   :  { %441 = vperm.xlu2 %608, %v412_v17  }
 0x21f   :  { %614 = vset.pattern.permute.xlu1 %v427_v53  ;;  %620 = vset.pattern.permute.xlu0 %v457_v19 }
 0x220   :  { %610 = vset.pattern.permute.xlu2 %v451_v50 }
 0x227   :  { %478 = vperm.xlu1 %614, %v461_v33  }
 0x228   :  { %453 = vperm.xlu2 %610, %v412_v17  }
 0x22f   :  { %616 = vset.pattern.permute.xlu1 %v439_v61 }
 0x230   :  { %613 = vset.pattern.permute.xlu2 %v421_v40  ;;  %v1048_v40 = vld [vmem:[#allocation8_spill] sm:$0xff] }
 0x237   :  { %490 = vperm.xlu1 %616, %v461_v33  }
 0x238   :  { %472 = vperm.xlu2 %613, %v461_v33  }
 0x23f   :  { %619 = vset.pattern.permute.xlu1 %v457_v19 }
 0x240   :  { %615 = vset.pattern.permute.xlu2 %v433_v39 }
 0x247   :  { %508 = vperm.xlu1 %619, %v461_v33  }
 0x248   :  { %484 = vperm.xlu2 %615, %v461_v33  }
 0x250   :  { %618 = vset.pattern.permute.xlu2 %v451_v50 }
 0x252   :  { %v418_v11 = vpop.permute.xlu2 %417 }
 0x253   :  { %v510_v58 = vmul.f32 %v418_v11, %v717_v5  ;;  %v511_v3 = vmul.f32 %v418_v11, %v719_v6 }
 0x255   :  { %542 = vst [vmem:[#allocation5] sm:$0xff] %v510_v58 }
 0x256   :  { %543 = vst [vmem:[#allocation5 + $0x8] sm:$0xff] %v511_v3 }
 0x258   :  { %502 = vperm.xlu2 %618, %v461_v33  }
 0x262   :  { %v436_v18 = vpop.permute.xlu2 %435 }
 0x263   :  { %v516_v28 = vmul.f32 %v436_v18, %v747_v20  ;;  %v517_v8 = vmul.f32 %v436_v18, %v749_v21 }
 0x265   :  { %548 = vst [vmem:[#allocation5 + $0x30] sm:$0xff] %v516_v28 }
 0x266   :  { %549 = vst [vmem:[#allocation5 + $0x38] sm:$0xff] %v517_v8 }
 0x269   :  { %v430_v12 = vpop.permute.xlu1 %429  ;;  %v424_v7 = vpop.permute.xlu0 %423 }
 0x26a   :  { %v514_v22 = vmul.f32 %v430_v12, %v711_v2  ;;  %v515_v34 = vmul.f32 %v430_v12, %v715_v4  ;;  %v512_v5 = vmul.f32 %v424_v7, %v733_v13  ;;  %v513_v6 = vmul.f32 %v424_v7, %v735_v14 }
 0x26c   :  { %546 = vst [vmem:[#allocation5 + $0x20] sm:$0xff] %v514_v22 }
 0x26d   :  { %547 = vst [vmem:[#allocation5 + $0x28] sm:$0xff] %v515_v34 }
 0x26e   :  { %544 = vst [vmem:[#allocation5 + $0x10] sm:$0xff] %v512_v5 }
 0x26f   :  { %545 = vst [vmem:[#allocation5 + $0x18] sm:$0xff] %v513_v6 }
 0x272   :  { %v442_v24 = vpop.permute.xlu2 %441 }
 0x273   :  { %v518_v20 = vmul.f32 %v442_v24, %v767_v30  ;;  %v519_v21 = vmul.f32 %v442_v24, %v769_v31 }
 0x275   :  { %550 = vst [vmem:[#allocation5 + $0x40] sm:$0xff] %v518_v20 }
 0x276   :  { %551 = vst [vmem:[#allocation5 + $0x48] sm:$0xff] %v519_v21 }
 0x279   :  { %v448_v41 = vpop.permute.xlu1 %447  ;;  %v467_v47 = vpop.permute.xlu0 %466 }
 0x27a   :  { %v520_v2 = vmul.f32 %v448_v41, %v777_v35  ;;  %v521_v4 = vmul.f32 %v448_v41, %v779_v36  ;;  %v526_v13 = vmul.f32 %v467_v47, %v707_v0  ;;  %v527_v14 = vmul.f32 %v467_v47, %v709_v1 }
 0x27c   :  { %552 = vst [vmem:[#allocation5 + $0x50] sm:$0xff] %v520_v2 }
 0x27d   :  { %553 = vst [vmem:[#allocation5 + $0x58] sm:$0xff] %v521_v4 }
 0x27e   :  { %558 = vst [vmem:[#allocation5 + $0x80] sm:$0xff] %v526_v13 }
 0x27f   :  { %559 = vst [vmem:[#allocation5 + $0x88] sm:$0xff] %v527_v14 }
 0x282   :  { %v454_v45 = vpop.permute.xlu2 %453 }
 0x283   :  { %v522_v30 = vmul.f32 %v454_v45, %v791_v42  ;;  %v523_v31 = vmul.f32 %v454_v45, %v793_v43 }
 0x285   :  { %554 = vst [vmem:[#allocation5 + $0x60] sm:$0xff] %v522_v30 }
 0x286   :  { %555 = vst [vmem:[#allocation5 + $0x68] sm:$0xff] %v523_v31 }
 0x289   :  { %v460_v56 = vpop.permute.xlu1 %459  ;;  %v497_v52 = vpop.permute.xlu0 %496 }
 0x28a   :  { %v524_v35 = vmul.f32 %v460_v56, %v815_v54  ;;  %v525_v36 = vmul.f32 %v460_v56, %v817_v55  ;;  %v536_v0 = vmul.f32 %v497_v52, %v781_v37  ;;  %v537_v1 = vmul.f32 %v497_v52, %v783_v38  ;;  %v1050_v38 = vld [vmem:[#allocation10_spill] sm:$0xff] }
 0x28c   :  { %556 = vst [vmem:[#allocation5 + $0x70] sm:$0xff] %v524_v35 }
 0x28d   :  { %557 = vst [vmem:[#allocation5 + $0x78] sm:$0xff] %v525_v36 }
 0x28e   :  { %568 = vst [vmem:[#allocation5 + $0xd0] sm:$0xff] %v536_v0 }
 0x28f   :  { %569 = vst [vmem:[#allocation5 + $0xd8] sm:$0xff] %v537_v1 }
 0x292   :  { %v473_v51 = vpop.permute.xlu2 %472 }
 0x293   :  { %v528_v42 = vmul.f32 %v473_v51, %v725_v9  ;;  %v529_v43 = vmul.f32 %v473_v51, %v727_v10  ;;  %v1052_v9 = vld [vmem:[#allocation12_spill] sm:$0xff]  ;;  %v1053_v10 = vld [vmem:[#allocation13_spill] sm:$0xff] }
 0x295   :  { %560 = vst [vmem:[#allocation5 + $0x90] sm:$0xff] %v528_v42 }
 0x296   :  { %561 = vst [vmem:[#allocation5 + $0x98] sm:$0xff] %v529_v43 }
 0x299   :  { %v479_v53 = vpop.permute.xlu1 %478 }
 0x29a   :  { %v530_v54 = vmul.f32 %v479_v53, %v1048_v40  ;;  %v531_v55 = vmul.f32 %v479_v53, %v1049_v60 }
 0x29c   :  { %562 = vst [vmem:[#allocation5 + $0xa0] sm:$0xff] %v530_v54 }
 0x29d   :  { %563 = vst [vmem:[#allocation5 + $0xa8] sm:$0xff] %v531_v55 }
 0x2a2   :  { %v485_v37 = vpop.permute.xlu2 %484 }
 0x2a3   :  { %v532_v46 = vmul.f32 %v485_v37, %v1050_v38  ;;  %v533_v15 = vmul.f32 %v485_v37, %v1051_v49 }
 0x2a5   :  { %564 = vst [vmem:[#allocation5 + $0xb0] sm:$0xff] %v532_v46 }
 0x2a6   :  { %565 = vst [vmem:[#allocation5 + $0xb8] sm:$0xff] %v533_v15 }
 0x2a9   :  { %v491_v26 = vpop.permute.xlu1 %490 }
 0x2aa   :  { %v534_v27 = vmul.f32 %v491_v26, %v1052_v9  ;;  %v535_v48 = vmul.f32 %v491_v26, %v1053_v10 }
 0x2ac   :  { %566 = vst [vmem:[#allocation5 + $0xc0] sm:$0xff] %v534_v27 }
 0x2ad   :  { %567 = vst [vmem:[#allocation5 + $0xc8] sm:$0xff] %v535_v48 }
 0x2b2   :  { %v503_v57 = vpop.permute.xlu2 %502 }
 0x2b3   :  { %v538_v25 = vmul.f32 %v503_v57, %v1054_v29  ;;  %v539_v16 = vmul.f32 %v503_v57, %v1055_v59 }
 0x2b5   :  { %570 = vst [vmem:[#allocation5 + $0xe0] sm:$0xff] %v538_v25 }
 0x2b6   :  { %571 = vst [vmem:[#allocation5 + $0xe8] sm:$0xff] %v539_v16 }
 0x2b9   :  { %v509_v23 = vpop.permute.xlu1 %508 }
 0x2ba   :  { %v540_v62 = vmul.f32 %v509_v23, %v1056_v32  ;;  %v541_v17 = vmul.f32 %v509_v23, %v1057_v63 }
 0x2bc   :  { %572 = vst [vmem:[#allocation5 + $0xf0] sm:$0xff] %v540_v62 }
 0x2bd   :  { %573 = vst [vmem:[#allocation5 + $0xf8] sm:$0xff] %v541_v17 }
 0x2be   :  { %586 = dma.vmem_to_hbm [thread:$0]  %s579_s8, 4096, %s581_s11, [#allocation4], %s678_s17, %s678_s17, %s679_s18  }
 0x2bf   :  { %675 = dma.done.wait [#allocation4], 4096  }
 0x2c0   :  { %676 = vsyncadd [#allocation4], 4294963200 }
 0x2c1   :  { %591 = vsyncpa [#allocation3], 1 }
 0x2c2   :  { %592 = vsyncpa [#allocation4], 1 }

</bundles_post_ra>
